<compile_context>
chip_gen: v6e
topology: v6e:2x2x1
jax: 0.10.0
libtpu: 0.0.40
codegen_flags: <defaults>
</compile_context>

<pallas_src>
import functools
import math

import jax
import jax.numpy as jnp
from jax import lax
from jax.experimental import pallas as pl
from jax.experimental.pallas import tpu as pltpu

LN_EPS = 1e-5  # nn.LayerNorm default


def _round_up(x, n):
    return ((x + n - 1) // n) * n


def _dynamic_linear_kernel(x_ref, w_ref, p_ref, o_ref, *, d_out):
    """Fused Linear + LayerNorm + ReLU (+ eval-mode Dropout identity).

    x_ref : (tm, d_in_p)       input rows (lane-padded if needed)
    w_ref : (d_in_p, d_out_p)  weight, pre-transposed, zero-padded
    p_ref : (3, d_out_p)       row 0 = linear bias, row 1 = LN gamma,
                               row 2 = LN beta (all zero in padded lanes)
    o_ref : (tm, d_out_p)      output rows in o_ref.dtype (padded lanes -> 0)
    d_out : real (unpadded) feature count used as LayerNorm denominator
    """
    # Linear: y = x @ W^T + b.  Padded output lanes are exactly 0
    # (zero weight columns + zero bias), so they drop out of the sums below.
    y = jnp.dot(x_ref[...], w_ref[...], preferred_element_type=jnp.float32)
    y = y + p_ref[0:1, :]

    # LayerNorm over the real d_out features, single reduction pass:
    #   mean = sum(y)/d_out ; var = sum(y^2)/d_out - mean^2 (biased, eps=1e-5)
    # var clamped at 0 to guard against f32 cancellation -> NaN in rsqrt.
    inv_n = jnp.float32(1.0 / d_out)
    s1 = jnp.sum(y, axis=-1, keepdims=True)
    s2 = jnp.sum(y * y, axis=-1, keepdims=True)
    mean = s1 * inv_n
    var = jnp.maximum(s2 * inv_n - mean * mean, 0.0)
    y_hat = (y - mean) * lax.rsqrt(var + LN_EPS)
    y_hat = y_hat * p_ref[1:2, :] + p_ref[2:3, :]   # padded lanes stay 0

    # ReLU; Dropout is identity in eval mode.
    o_ref[...] = jnp.maximum(y_hat, 0.0).astype(o_ref.dtype)


def _choose_row_tile(m, d_out_p, row_tile):
    """Row-tile size: cap by LN-intermediate pressure, keep a multiple of 8."""
    if d_out_p >= 1024:
        cap = 64
    elif d_out_p >= 512:
        cap = 128
    else:
        cap = row_tile
    tm = min(_round_up(cap, 8), _round_up(max(m, 1), 8))
    # v7x has 2 TensorCores: if the whole problem fits one tile and there are
    # enough rows, split it so the "parallel" axis can be sharded across cores.
    if m >= 32 and pl.cdiv(m, tm) < 2:
        tm = _round_up(pl.cdiv(m, 2), 8)
    return tm


def _vmem_budget(tm, d_in_p, d_out_p, x_bytes, out_bytes, w_bytes):
    """VMEM request derived from the actual tile footprint, capped per chip."""
    need = (2 * tm * d_in_p * x_bytes        # double-buffered x tiles
            + 2 * tm * d_out_p * out_bytes   # double-buffered out tiles
            + 2 * d_in_p * d_out_p * w_bytes # resident weight block (buffered)
            + 4 * tm * d_out_p * 4           # f32 LN intermediates / headroom
            + 2 * 8 * d_out_p * 4)           # packed params
    need = int(need * 1.25) + (1 << 20)      # 25% + 1 MiB slack for Mosaic
    try:
        cap = int(pltpu.get_tpu_info().vmem_capacity_bytes)
    except Exception:  # interpret mode / unknown chip: assume smallest (v7x)
        cap = 64 * 1024 * 1024
    # Never request more than 75% of physical VMEM (leave scratch/spill room),
    # never request less than the default scoped limit.
    return min((cap * 3) // 4, max(need, 32 * 1024 * 1024))


def dynamic_layer_linear(x, weight, bias, gamma, beta, *, row_tile=256):
    """Apply DynamicLayer(LINEAR) forward: Linear -> LayerNorm -> ReLU.

    Args:
      x:      (..., input_dim), typically (batch, seq, input_dim)
      weight: (output_dim, input_dim)  -- PyTorch nn.Linear layout
      bias:   (output_dim,)
      gamma:  (output_dim,)  LayerNorm weight
      beta:   (output_dim,)  LayerNorm bias
      row_tile: target rows per grid step (multiple of 8).
    Returns:
      (..., output_dim) in x.dtype (f32 math inside the kernel).
    """
    orig_lead = x.shape[:-1]
    d_in = x.shape[-1]
    d_out = weight.shape[0]
    m = math.prod(orig_lead)
    out_dtype = x.dtype

    # Lane-dense feature padding only when not already 128-aligned.
    d_in_p = d_in if d_in % 128 == 0 else _round_up(d_in, 128)
    d_out_p = d_out if d_out % 128 == 0 else _round_up(d_out, 128)

    tm = _choose_row_tile(m, d_out_p, row_tile)
    grid = (pl.cdiv(m, tm),)   # partial last block handled by Pallas masking

    x2d = x.reshape(m, d_in)
    if d_in_p != d_in:
        x2d = jnp.pad(x2d, ((0, 0), (0, d_in_p - d_in)))

    # NOTE(perf): if this layer is applied repeatedly, hoist the transpose/pad
    # of the weight and the param packing out of the per-call path.
    w_t = weight.T
    if d_in_p != d_in or d_out_p != d_out:
        w_t = jnp.pad(w_t, ((0, d_in_p - d_in), (0, d_out_p - d_out)))

    # Pack bias / gamma / beta into one (3, d_out_p) array (single DMA).
    params = jnp.stack([bias, gamma, beta]).astype(jnp.float32)
    if d_out_p != d_out:
        params = jnp.pad(params, ((0, 0), (0, d_out_p - d_out)))  # zeros only!

    kernel = functools.partial(_dynamic_linear_kernel, d_out=d_out)
    vmem_limit = _vmem_budget(
        tm, d_in_p, d_out_p,
        jnp.dtype(x2d.dtype).itemsize,
        jnp.dtype(out_dtype).itemsize,
        jnp.dtype(w_t.dtype).itemsize,
    )

    # TODO(synk): consider pipeline_mode=pl.Buffered(3) on the x BlockSpec if
    #             profiling shows exposed DMA for very small d_in tiles.
    out2d = pl.pallas_call(
        kernel,
        out_shape=jax.ShapeDtypeStruct((m, d_out_p), out_dtype),
        grid_spec=pltpu.PrefetchScalarGridSpec(
            num_scalar_prefetch=0,
            grid=grid,
            in_specs=[
                pl.BlockSpec((tm, d_in_p), lambda i: (i, 0)),       # x rows
                pl.BlockSpec((d_in_p, d_out_p), lambda i: (0, 0)),  # weight
                pl.BlockSpec((3, d_out_p), lambda i: (0, 0)),       # b/g/beta
            ],
            out_specs=pl.BlockSpec((tm, d_out_p), lambda i: (i, 0)),
        ),
        compiler_params=pltpu.CompilerParams(
            dimension_semantics=("parallel",),
            vmem_limit_bytes=vmem_limit,
        ),
    )(x2d, w_t, params)

    if d_out_p != d_out:
        out2d = out2d[:, :d_out]
    return out2d.reshape(*orig_lead, d_out)


def _reference(x, weight, bias, gamma, beta):
    """Pure-JAX reference: Linear -> LayerNorm -> ReLU (eval-mode dropout)."""
    y = jnp.einsum("...d,od->...o", x.astype(jnp.float32),
                   weight.astype(jnp.float32)) + bias
    mean = jnp.mean(y, axis=-1, keepdims=True)
    var = jnp.mean((y - mean) ** 2, axis=-1, keepdims=True)
    y = (y - mean) * lax.rsqrt(var + LN_EPS) * gamma + beta
    return jnp.maximum(y, 0.0).astype(x.dtype)


if __name__ == "__main__":
    key = jax.random.PRNGKey(0)

    def _make_case(k, batch, seq, d_in, d_out):
        kx, kw, kb = jax.random.split(k, 3)
        x = jax.random.normal(kx, (batch, seq, d_in), dtype=jnp.float32)
        bound = 1.0 / jnp.sqrt(jnp.float32(d_in))
        weight = jax.random.uniform(kw, (d_out, d_in), jnp.float32, -bound, bound)
        bias = jax.random.uniform(kb, (d_out,), jnp.float32, -bound, bound)
        gamma = jnp.ones((d_out,), jnp.float32)   # nn.LayerNorm defaults
        beta = jnp.zeros((d_out,), jnp.float32)
        return x, weight, bias, gamma, beta

    k1, k2 = jax.random.split(key)

    # Case 1: LINEAR config shapes (batch=2, seq=8, input_dim=32 -> output_dim=32)
    # exercises the lane-padded path.
    args1 = _make_case(k1, 2, 8, 32, 32)
    out1 = jax.block_until_ready(dynamic_layer_linear(*args1))
    ref1 = _reference(*args1)
    assert out1.shape == (2, 8, 32)
    assert out1.dtype == args1[0].dtype
    assert jnp.allclose(out1, ref1, atol=1e-4, rtol=1e-5), "mismatch (padded path)"

    # Case 2: 128-aligned dims exercise the no-padding fast path.
    args2 = _make_case(k2, 2, 8, 128, 128)
    out2 = jax.block_until_ready(dynamic_layer_linear(*args2))
    ref2 = _reference(*args2)
    assert out2.shape == (2, 8, 128)
    assert jnp.allclose(out2, ref2, atol=1e-4, rtol=1e-5), "mismatch (aligned path)"

    print("KERNEL_OK")
</pallas_src>

<mosaic_0001>
module attributes {stable_mosaic.version = 11 : i64} {
  func.func @_dynamic_linear_kernel(%arg0: i32, %arg1: memref<16x128xf32, #tpu.memory_space<vmem>>, %arg2: memref<128x128xf32, #tpu.memory_space<vmem>>, %arg3: memref<3x128xf32, #tpu.memory_space<vmem>>, %arg4: memref<16x128xf32, #tpu.memory_space<vmem>>) attributes {dimension_semantics = [#tpu.dimension_semantics<parallel>], iteration_bounds = array<i64: 1>, scalar_prefetch = 0 : i64, scratch_operands = 0 : i64, tpu.core_type = #tpu.core_type<tc>, window_params = [{transform_indices = @transform_0, window_bounds = array<i64: 16, 128>}, {pipeline_mode = #tpu.pipeline_mode<synchronous>, transform_indices = @transform_1, window_bounds = array<i64: 128, 128>}, {pipeline_mode = #tpu.pipeline_mode<synchronous>, transform_indices = @transform_2, window_bounds = array<i64: 3, 128>}, {transform_indices = @transform_3, window_bounds = array<i64: 16, 128>}]} {
    %c0 = arith.constant 0 : index
    %c0_0 = arith.constant 0 : index
    %0 = vector.load %arg1[%c0, %c0_0] : memref<16x128xf32, #tpu.memory_space<vmem>>, vector<16x128xf32>
    %c0_1 = arith.constant 0 : index
    %c0_2 = arith.constant 0 : index
    %1 = vector.load %arg2[%c0_1, %c0_2] : memref<128x128xf32, #tpu.memory_space<vmem>>, vector<128x128xf32>
    %cst = arith.constant dense<0.000000e+00> : vector<16x128xf32>
    %2 = tpu.matmul %0, %1, %cst {dimension_numbers = #tpu.dot_dimension_numbers<[1], [0], [0], [1], [0, 0, 1, 1], [], []>} : vector<16x128xf32>, vector<128x128xf32>, vector<16x128xf32> -> vector<16x128xf32>
    %c0_3 = arith.constant 0 : index
    %c0_4 = arith.constant 0 : index
    %3 = vector.load %arg3[%c0_3, %c0_4] : memref<3x128xf32, #tpu.memory_space<vmem>>, vector<1x128xf32>
    %4 = vector.broadcast %3 : vector<1x128xf32> to vector<16x128xf32>
    %5 = arith.addf %2, %4 : vector<16x128xf32>
    %cst_5 = arith.constant dense<0.000000e+00> : vector<16xf32>
    %6 = vector.multi_reduction <add>, %5, %cst_5 [1] : vector<16x128xf32> to vector<16xf32>
    %7 = vector.shape_cast %6 : vector<16xf32> to vector<16x1xf32>
    %8 = arith.mulf %5, %5 : vector<16x128xf32>
    %cst_6 = arith.constant dense<0.000000e+00> : vector<16xf32>
    %9 = vector.multi_reduction <add>, %8, %cst_6 [1] : vector<16x128xf32> to vector<16xf32>
    %10 = vector.shape_cast %9 : vector<16xf32> to vector<16x1xf32>
    %cst_7 = arith.constant 3.125000e-02 : f32
    %11 = vector.broadcast %cst_7 : f32 to vector<16x1xf32>
    %12 = arith.mulf %7, %11 : vector<16x1xf32>
    %cst_8 = arith.constant 3.125000e-02 : f32
    %13 = vector.broadcast %cst_8 : f32 to vector<16x1xf32>
    %14 = arith.mulf %10, %13 : vector<16x1xf32>
    %15 = arith.mulf %12, %12 : vector<16x1xf32>
    %16 = arith.subf %14, %15 : vector<16x1xf32>
    %cst_9 = arith.constant 0.000000e+00 : f32
    %17 = vector.broadcast %cst_9 : f32 to vector<16x1xf32>
    %18 = arith.maximumf %16, %17 : vector<16x1xf32>
    %19 = vector.broadcast %12 : vector<16x1xf32> to vector<16x128xf32>
    %20 = arith.subf %5, %19 : vector<16x128xf32>
    %cst_10 = arith.constant 9.99999974E-6 : f32
    %21 = vector.broadcast %cst_10 : f32 to vector<16x1xf32>
    %22 = arith.addf %18, %21 : vector<16x1xf32>
    %23 = math.rsqrt %22 : vector<16x1xf32>
    %24 = vector.broadcast %23 : vector<16x1xf32> to vector<16x128xf32>
    %25 = arith.mulf %20, %24 : vector<16x128xf32>
    %c1 = arith.constant 1 : index
    %c0_11 = arith.constant 0 : index
    %26 = vector.load %arg3[%c1, %c0_11] : memref<3x128xf32, #tpu.memory_space<vmem>>, vector<1x128xf32>
    %27 = vector.broadcast %26 : vector<1x128xf32> to vector<16x128xf32>
    %28 = arith.mulf %25, %27 : vector<16x128xf32>
    %c2 = arith.constant 2 : index
    %c0_12 = arith.constant 0 : index
    %29 = vector.load %arg3[%c2, %c0_12] : memref<3x128xf32, #tpu.memory_space<vmem>>, vector<1x128xf32>
    %30 = vector.broadcast %29 : vector<1x128xf32> to vector<16x128xf32>
    %31 = arith.addf %28, %30 : vector<16x128xf32>
    %cst_13 = arith.constant 0.000000e+00 : f32
    %32 = vector.broadcast %cst_13 : f32 to vector<16x128xf32>
    %33 = arith.maximumf %31, %32 : vector<16x128xf32>
    %c0_14 = arith.constant 0 : index
    %c0_15 = arith.constant 0 : index
    %34 = vector.load %arg4[%c0_14, %c0_15] : memref<16x128xf32, #tpu.memory_space<vmem>>, vector<16x128xf32>
    tpu.vector_store %arg4[%c0_14, %c0_15], %33 {strides = array<i32>} : memref<16x128xf32, #tpu.memory_space<vmem>>, vector<16x128xf32>,
    return
  }
  func.func @transform_0(%arg0: i32) -> (i32, i32) {
    %c0_i32 = arith.constant 0 : i32
    %c0_i32_0 = arith.constant 0 : i32
    return %arg0, %c0_i32 : i32, i32
  }
  func.func @transform_1(%arg0: i32) -> (i32, i32) {
    %c0_i32 = arith.constant 0 : i32
    %c0_i32_0 = arith.constant 0 : i32
    %c0_i32_1 = arith.constant 0 : i32
    return %c0_i32, %c0_i32_0 : i32, i32
  }
  func.func @transform_2(%arg0: i32) -> (i32, i32) {
    %c0_i32 = arith.constant 0 : i32
    %c0_i32_0 = arith.constant 0 : i32
    %c0_i32_1 = arith.constant 0 : i32
    return %c0_i32, %c0_i32_0 : i32, i32
  }
  func.func @transform_3(%arg0: i32) -> (i32, i32) {
    %c0_i32 = arith.constant 0 : i32
    %c0_i32_0 = arith.constant 0 : i32
    return %arg0, %c0_i32 : i32, i32
  }
}

</mosaic_0001>

<bundles_post_ra>
// kernel: tpu_custom_call.1
= control target key start
LH: loop header
LB: loop body
LE: loop exit
PB: predicated region body
PF: predicated region fallthrough
CT: control target
= control target key end

     0   :  { %8 = vsyncpa [#allocation3], 0  ;;  %s415_s0 = inlined_call_operand.hbm [shape: f32[16,128], index: 0, kind: input, shape index: {}]   ;;  %s416_s1 = inlined_call_operand.hbm [shape: f32[128,128], index: 1, kind: input, shape index: {}]   ;;  %s417_s2 = inlined_call_operand.hbm [shape: f32[3,128], index: 2, kind: input, shape index: {}]   ;;  %s418_s3 = inlined_call_operand.hbm [shape: f32[16,128], index: 3, kind: output, shape index: {}]  }
   0x1   :  { %9 = vsyncpa [#allocation6], 0 }
   0x2   :  { %10 = vsyncpa [#allocation4], 0  ;;  %s368_s12 = smov [#allocation5]   ;;  %s369_s14 = smov [#allocation2]  }
   0x3   :  { %s28_s13 = sshll.u32 %s368_s12, 4  ;;  %s16_s15 = sshll.u32 %s369_s14, 4  ;;  %s29_s13 = int_to_ptr.vmem [resolvable:$true] %s28_s13  ;;  %s17_s15 = int_to_ptr.vmem [resolvable:$true] %s16_s15 }
   0x4   :  { %s290_s16 = scalar_lea.vmem %s29_s13, 2048  ;;  %p295_p1 = scmp.lt.s32.totalorder %s29_s13, %s29_s13 }
   0x5   :  { %p291_p0 = scmp.ne.s32.totalorder %s29_s13, %s290_s16  ;;  %p296_p2 = scmp.lt.s32.totalorder %s290_s16, %s290_s16 }
   0x7   :  { %p297_p3 = por %p296_p2, %p295_p1 }
   0x9   :  { %p298_p4 = pnand %p297_p3, %p291_p0 }
   0xb   :  { %301 = shalt.err (!%p298_p4)
}
   0xc   :  { %s370_s17 = smov 128   ;;  %s371_s18 = smov 8  }
   0xd   :  { %34 = dma.hbm_to_vmem [thread:$0]  %s416_s1, 2048, %s29_s13, [#allocation6], %s370_s17, %s370_s17, %s371_s18  }
   0xe   :  { %s310_s21 = scalar_lea.vmem %s17_s15, 256  ;;  %p315_p6 = scmp.lt.s32.totalorder %s17_s15, %s17_s15 }
   0xf   :  { %p311_p5 = scmp.ne.s32.totalorder %s17_s15, %s310_s21  ;;  %p316_p7 = scmp.lt.s32.totalorder %s310_s21, %s310_s21 }
  0x11   :  { %p317_p8 = por %p316_p7, %p315_p6 }
  0x13   :  { %p318_p9 = pnand %p317_p8, %p311_p5 }
  0x15   :  { %321 = shalt.err (!%p318_p9)
}
  0x16   :  { %22 = dma.hbm_to_vmem [thread:$0]  %s415_s0, 256, %s17_s15, [#allocation3], %s370_s17, %s370_s17, %s371_s18  }
  0x17   :  { %s372_s24 = smov [#allocation7]  }
  0x18   :  { %s41_s25 = sshll.u32 %s372_s24, 4  ;;  %s42_s25 = int_to_ptr.vmem [resolvable:$true] %s41_s25 }
  0x19   :  { %s330_s26 = scalar_lea.vmem %s42_s25, 64  ;;  %p335_p11 = scmp.lt.s32.totalorder %s42_s25, %s42_s25 }
  0x1a   :  { %p331_p10 = scmp.ne.s32.totalorder %s42_s25, %s330_s26  ;;  %p336_p12 = scmp.lt.s32.totalorder %s330_s26, %s330_s26 }
  0x1c   :  { %p337_p13 = por %p336_p12, %p335_p11 }
  0x1e   :  { %p338_p0 = pnand %p337_p13, %p331_p10 }
  0x20   :  { %341 = shalt.err (!%p338_p0)
}
  0x21   :  { %44 = dma.hbm_to_vmem [thread:$0]  %s417_s2, 64, %s42_s25, [#allocation6]  }
  0x22   :  { %362 = dma.done.wait [#allocation3], 256  }
  0x23   :  { %363 = vsyncadd [#allocation3], 4294967040 }
  0x24   :  { %364 = dma.done.wait [#allocation6], 2112  }
  0x25   :  { %365 = vsyncadd [#allocation6], 4294965184  ;;  %v71_v0 = vld [vmem:[#allocation5 + $0x78] sm:$0xff]  ;;  %v70_v1 = vld [vmem:[#allocation5 + $0x70] sm:$0xff]  ;;  %s373_s0 = smov [#allocation8]  }
  0x26   :  { %237 = vmatprep.subr.mxu0 %v71_v0  ;;  %v69_v2 = vld [vmem:[#allocation5 + $0x68] sm:$0xff]  ;;  %v68_v3 = vld [vmem:[#allocation5 + $0x60] sm:$0xff]  ;;  %v54_v4 = vld [vmem:[#allocation2] sm:$0xff]  ;;  %s203_s2 = sshll.u32 %s373_s0, 4  ;;  %s204_s2 = int_to_ptr.vmem [resolvable:$true] %s203_s2 }
  0x27   :  { %238 = vmatpush3.msra.mxu0 %v71_v0  ;;  %v67_v5 = vld [vmem:[#allocation5 + $0x58] sm:$0xff]  ;;  %269 = vmatprep.mubr.f32.mxu0 %v54_v4  ;;  %v66_v6 = vld [vmem:[#allocation5 + $0x50] sm:$0xff]  ;;  %v65_v7 = vld [vmem:[#allocation5 + $0x48] sm:$0xff]  ;;  %s342_s28 = scalar_lea.vmem %s204_s2, 256  ;;  %p347_p2 = scmp.lt.s32.totalorder %s204_s2, %s204_s2 }
  0x28   :  { %239 = vmatprep.subr.mxu0 %v70_v1  ;;  %v64_v8 = vld [vmem:[#allocation5 + $0x40] sm:$0xff]  ;;  %v63_v9 = vld [vmem:[#allocation5 + $0x38] sm:$0xff]  ;;  %v62_v10 = vld [vmem:[#allocation5 + $0x30] sm:$0xff]  ;;  %p343_p1 = scmp.ne.s32.totalorder %s204_s2, %s342_s28  ;;  %p348_p3 = scmp.lt.s32.totalorder %s342_s28, %s342_s28 }
  0x29   :  { %240 = vmatpush3.msra.mxu0 %v70_v1  ;;  %v61_v11 = vld [vmem:[#allocation5 + $0x28] sm:$0xff]  ;;  %v60_v12 = vld [vmem:[#allocation5 + $0x20] sm:$0xff]  ;;  %v59_v13 = vld [vmem:[#allocation5 + $0x18] sm:$0xff] }
  0x2a   :  { %241 = vmatprep.subr.mxu0 %v69_v2  ;;  %v58_v14 = vld [vmem:[#allocation5 + $0x10] sm:$0xff]  ;;  %v57_v15 = vld [vmem:[#allocation5 + $0x8] sm:$0xff]  ;;  %v56_v16 = vld [vmem:[#allocation5] sm:$0xff]  ;;  %p349_p4 = por %p348_p3, %p347_p2 }
  0x2b   :  { %242 = vmatpush3.msra.mxu0 %v69_v2  ;;  %v55_v17 = vld [vmem:[#allocation2 + $0x8] sm:$0xff]  ;;  %v216_v19 = vld [vmem:[#allocation7] ss:$0 sm:$0xff]  ;;  %v217_v43 = vld [vmem:[#allocation7 + $0x1] ss:$0 sm:$0xff] }
  0x2c   :  { %243 = vmatprep.subr.mxu0 %v68_v3  ;;  %v218_v45 = vld [vmem:[#allocation7 + $0x2] ss:$0 sm:$0xff]  ;;  %p350_p5 = pnand %p349_p4, %p343_p1 }
  0x2d   :  { %244 = vmatpush3.msra.mxu0 %v68_v3 }
  0x2e   :  { %245 = vmatprep.subr.mxu0 %v67_v5 }
  0x2f   :  { %246 = vmatpush3.msra.mxu0 %v67_v5 }
  0x30   :  { %247 = vmatprep.subr.mxu0 %v66_v6 }
  0x31   :  { %248 = vmatpush3.msra.mxu0 %v66_v6 }
  0x32   :  { %249 = vmatprep.subr.mxu0 %v65_v7 }
  0x33   :  { %250 = vmatpush3.msra.mxu0 %v65_v7 }
  0x34   :  { %251 = vmatprep.subr.mxu0 %v64_v8 }
  0x35   :  { %252 = vmatpush3.msra.mxu0 %v64_v8 }
  0x36   :  { %253 = vmatprep.subr.mxu0 %v63_v9 }
  0x37   :  { %254 = vmatpush3.msra.mxu0 %v63_v9 }
  0x38   :  { %255 = vmatprep.subr.mxu0 %v62_v10 }
  0x39   :  { %256 = vmatpush3.msra.mxu0 %v62_v10 }
  0x3a   :  { %257 = vmatprep.subr.mxu0 %v61_v11 }
  0x3b   :  { %258 = vmatpush3.msra.mxu0 %v61_v11 }
  0x3c   :  { %259 = vmatprep.subr.mxu0 %v60_v12 }
  0x3d   :  { %260 = vmatpush3.msra.mxu0 %v60_v12 }
  0x3e   :  { %261 = vmatprep.subr.mxu0 %v59_v13 }
  0x3f   :  { %262 = vmatpush3.msra.mxu0 %v59_v13 }
  0x40   :  { %263 = vmatprep.subr.mxu0 %v58_v14 }
  0x41   :  { %264 = vmatpush3.msra.mxu0 %v58_v14 }
  0x42   :  { %265 = vmatprep.subr.mxu0 %v57_v15 }
  0x43   :  { %266 = vmatpush3.msra.mxu0 %v57_v15 }
  0x44   :  { %267 = vmatprep.subr.mxu0 %v56_v16 }
  0x45   :  { %268 = vmatpush3.msra.mxu0 %v56_v16 }
  0x46   :  { %270 = vmatmul.mubr.f32.vlgmr.msra.gmra.mxu0 %v55_v17 }
 0x106   :  { %v271_v18 = vpop.f32.mrf.mxu0 }
 0x107   :  { %v149_v22 = vadd.f32 %v271_v18, %v216_v19 }
 0x108   :  { %v143_v20 = vpop.f32.mrf.mxu0 }
 0x109   :  { %v144_v21 = vadd.f32 %v216_v19, %v143_v20  ;;  %v157_v24 = vmul.f32 %v149_v22, %v149_v22 }
 0x10b   :  { %152 = vadd.xlane.f32.xlu0 %v144_v21  ;;  %v156_v23 = vmul.f32 %v144_v21, %v144_v21 }
 0x10d   :  { %158 = vadd.xlane.f32.xlu1 %v156_v23 }
 0x10f   :  { %154 = vadd.xlane.f32.xlu0 %v149_v22 }
 0x111   :  { %160 = vadd.xlane.f32.xlu1 %v157_v24 }
 0x194   :  { %v153_v25 = vpop.xlane.xlu0 %152 }
 0x195   :  { %v162_v26 = vmul.f32 0.03125, %v153_v25 }
 0x196   :  { %v159_v27 = vpop.xlane.xlu1 %158 }
 0x197   :  { %v166_v28 = vmul.f32 %v162_v26, %v162_v26  ;;  %v164_v29 = vmul.f32 0.03125, %v159_v27  ;;  %v172_v41 = vsub.f32 %v144_v21, %v162_v26 }
 0x198   :  { %v155_v30 = vpop.xlane.xlu0 %154 }
 0x199   :  { %v168_v31 = vsub.f32 %v164_v29, %v166_v28  ;;  %v163_v32 = vmul.f32 0.03125, %v155_v30 }
 0x19a   :  { %v161_v33 = vpop.xlane.xlu1 %160 }
 0x19b   :  { %v170_v34 = vmax.f32 %v168_v31, 0.0  ;;  %v167_v35 = vmul.f32 %v163_v32, %v163_v32  ;;  %v165_v36 = vmul.f32 0.03125, %v161_v33  ;;  %v173_v46 = vsub.f32 %v149_v22, %v163_v32 }
 0x19d   :  { %v174_v37 = vadd.f32 1e-05, %v170_v34  ;;  %v169_v38 = vsub.f32 %v165_v36, %v167_v35 }
 0x19f   :  { %278 = vrsqrt.f32 %v174_v37  ;;  %v171_v39 = vmax.f32 %v169_v38, 0.0 }
 0x1a1   :  { %v175_v40 = vadd.f32 1e-05, %v171_v39 }
 0x1a3   :  { %280 = vrsqrt.f32 %v175_v40 }
 0x1ac   :  { %v279_v42 = vpop.eup %278 }
 0x1ad   :  { %v178_v44 = vmul.f32 %v279_v42, %v172_v41 }
 0x1af   :  { %v185_v47 = vmul.f32 %v217_v43, %v178_v44 }
 0x1b0   :  { %v281_v48 = vpop.eup %280 }
 0x1b1   :  { %v179_v49 = vmul.f32 %v281_v48, %v173_v46  ;;  %v192_v50 = vadd.f32 %v218_v45, %v185_v47 }
 0x1b3   :  { %v186_v51 = vmul.f32 %v217_v43, %v179_v49  ;;  %v194_v52 = vmax.f32 %v192_v50, 0.0 }
 0x1b5   :  { %v193_v53 = vadd.f32 %v218_v45, %v186_v51  ;;  %196 = vst [vmem:[#allocation8] sm:$0xff] %v194_v52 }
 0x1b7   :  { %v195_v54 = vmax.f32 %v193_v53, 0.0 }
 0x1b9   :  { %197 = vst [vmem:[#allocation8 + $0x8] sm:$0xff] %v195_v54 }
 0x1ba   :  { %353 = shalt.err (!%p350_p5)
}
 0x1bb   :  { %209 = dma.vmem_to_hbm [thread:$0]  %s204_s2, 256, %s418_s3, [#allocation4], %s370_s17, %s370_s17, %s371_s18  }
 0x1bc   :  { %366 = dma.done.wait [#allocation4], 256  }
 0x1bd   :  { %367 = vsyncadd [#allocation4], 4294967040 }
 0x1be   :  { %213 = vsyncpa [#allocation3], 1 }
 0x1bf   :  { %214 = vsyncpa [#allocation6], 1 }
 0x1c0   :  { %215 = vsyncpa [#allocation4], 1 }

</bundles_post_ra>
